<compile_context>
chip_gen: v7x
topology: tpu7x:2x2x1
jax: 0.10.0
libtpu: 0.0.40
codegen_flags: <defaults>
</compile_context>

<pallas_src>
import jax
import jax.numpy as jnp
import numpy as np
from jax import lax
from jax.experimental import pallas as pl
from jax.experimental.pallas import tpu as pltpu

# ---------------- model hyper-parameters (small, consistent with __init__) ---
DIM = 32                      # model dim
NUM_HEADS = 4
DIM_HEAD = 8
INNER_DIM = NUM_HEADS * DIM_HEAD   # 32
SEQ = 16
BATCH = 2
LN_EPS = 1e-5
HEAD_SHIFT = DIM_HEAD.bit_length() - 1   # log2(DIM_HEAD) = 3


def norm_linear_attn_kernel(x_ref, wqkv_ref, wout_ref, bout_ref, o_ref):
    """One grid step == one batch element.

    x_ref   : (N, DIM)        f32
    wqkv_ref: (DIM, 3*INNER)  bf16
    wout_ref: (INNER, DIM)    bf16  (gamma folded in)
    bout_ref: (1, DIM)        f32   (beta @ W_out + b_out folded in)
    o_ref   : (N, DIM)        f32
    """
    x = x_ref[...].astype(jnp.bfloat16)                        # (N, DIM)

    # ---- QKV projection (single MXU matmul, f32 accumulate) ----
    qkv = jnp.dot(x, wqkv_ref[...],
                  preferred_element_type=jnp.float32)          # (N, 3*INNER)

    q = jnp.maximum(qkv[:, 0 * INNER_DIM:1 * INNER_DIM], 0.0)  # relu(q)
    k = jnp.maximum(qkv[:, 1 * INNER_DIM:2 * INNER_DIM], 0.0)  # relu(k)
    v = qkv[:, 2 * INNER_DIM:3 * INNER_DIM]

    # ---- linear attention: full (INNER, INNER) k^T v in ONE dot_general,
    #      contracting the sequence (sublane) axis directly -> no transpose.
    kv = lax.dot_general(k.astype(jnp.bfloat16), v.astype(jnp.bfloat16),
                         (((0,), (0,)), ((), ())),
                         preferred_element_type=jnp.float32)   # (INNER, INNER)

    # Block-diagonal head mask: same head <=> high bits of (m, d) match.
    # Power-of-two head size -> shifts (no integer divide on the VPU).
    r = lax.broadcasted_iota(jnp.int32, (INNER_DIM, INNER_DIM), 0)
    c = lax.broadcasted_iota(jnp.int32, (INNER_DIM, INNER_DIM), 1)
    kv = jnp.where((r >> HEAD_SHIFT) == (c >> HEAD_SHIFT), kv, 0.0)

    attn = jnp.dot(q.astype(jnp.bfloat16), kv.astype(jnp.bfloat16),
                   preferred_element_type=jnp.float32)         # (N, INNER)

    # ---- LayerNorm over the feature dim (affine folded into wout/bout) ----
    mean = jnp.mean(attn, axis=-1, keepdims=True)
    cen = attn - mean
    var = jnp.mean(cen * cen, axis=-1, keepdims=True)
    ln = cen * lax.rsqrt(var + LN_EPS)                         # (N, INNER)

    # ---- output projection (+ folded bias) ----
    out = jnp.dot(ln.astype(jnp.bfloat16), wout_ref[...],
                  preferred_element_type=jnp.float32) + bout_ref[...]
    o_ref[...] = out.astype(o_ref.dtype)                       # (N, DIM)


def norm_linear_attention(x, w_qkv, gamma, beta, w_out, b_out):
    """x: (B, N, DIM) float32 -> (B, N, DIM) float32."""
    B, N, C = x.shape
    assert C == DIM
    assert N % 8 == 0, "per-batch block needs sublane-aligned sequence length"

    # Fold LN affine and output bias into the projection (host-side, one-time):
    #   (cen/std * gamma + beta) @ W + b == (cen/std) @ (diag(gamma) W) + (beta @ W + b)
    w_out_f = (gamma[:, None] * w_out).astype(jnp.bfloat16)     # (INNER, DIM)
    b_out_f = (beta @ w_out + b_out).reshape(1, DIM).astype(jnp.float32)
    w_qkv_b = w_qkv.astype(jnp.bfloat16)                        # (DIM, 3*INNER)

    x2 = x.reshape(B * N, DIM)

    out = pl.pallas_call(
        norm_linear_attn_kernel,
        out_shape=jax.ShapeDtypeStruct((B * N, DIM), x.dtype),
        grid_spec=pltpu.PrefetchScalarGridSpec(
            num_scalar_prefetch=0,
            grid=(B,),                                # batch axis -> 2 TCs on v7x
            in_specs=[
                pl.BlockSpec((N, DIM), lambda b: (b, 0)),
                pl.BlockSpec((DIM, 3 * INNER_DIM), lambda b: (0, 0)),
                pl.BlockSpec((INNER_DIM, DIM), lambda b: (0, 0)),
                pl.BlockSpec((1, DIM), lambda b: (0, 0)),
            ],
            out_specs=pl.BlockSpec((N, DIM), lambda b: (b, 0)),
        ),
        compiler_params=pltpu.CompilerParams(
            dimension_semantics=("parallel",)),
    )(x2, w_qkv_b, w_out_f, b_out_f)

    return out.reshape(B, N, DIM)


def reference(x, w_qkv, gamma, beta, w_out, b_out):
    """Pure-JAX fp32 reference (HIGHEST precision) mirroring the PyTorch forward."""
    B, N, _ = x.shape
    hp = lax.Precision.HIGHEST
    qkv = jnp.dot(x, w_qkv, precision=hp)                       # (B, N, 3*INNER)
    q, k, v = jnp.split(qkv, 3, axis=-1)

    def to_heads(t):  # b n (h d) -> b h n d
        return t.reshape(B, N, NUM_HEADS, DIM_HEAD).transpose(0, 2, 1, 3)

    q, k, v = map(to_heads, (q, k, v))
    q = jax.nn.relu(q)
    k = jax.nn.relu(k)
    kv = jnp.einsum('bhnm,bhnd->bhmd', k, v, precision=hp)
    o = jnp.einsum('bhnm,bhmd->bhnd', q, kv, precision=hp)
    o = o.transpose(0, 2, 1, 3).reshape(B, N, INNER_DIM)        # b h n d -> b n (h d)
    mean = o.mean(-1, keepdims=True)
    var = ((o - mean) ** 2).mean(-1, keepdims=True)
    o = (o - mean) / jnp.sqrt(var + LN_EPS) * gamma + beta
    return jnp.dot(o, w_out, precision=hp) + b_out


if __name__ == "__main__":
    key = jax.random.PRNGKey(0)
    kx, kw1, kw2, kb2, kg, kb = jax.random.split(key, 6)

    x = jax.random.normal(kx, (BATCH, SEQ, DIM), dtype=jnp.float32)

    # Deterministic synthetic parameters (stored as (in, out) so the kernel
    # computes x @ W directly; equivalent to PyTorch's x @ W.T).  gamma/beta
    # are non-trivial so the host-side folding is actually exercised.
    w_qkv = 0.05 * jax.random.normal(kw1, (DIM, 3 * INNER_DIM), jnp.float32)
    w_out = 0.05 * jax.random.normal(kw2, (INNER_DIM, DIM), jnp.float32)
    b_out = 0.01 * jax.random.normal(kb2, (DIM,), jnp.float32)
    gamma = 1.0 + 0.1 * jax.random.normal(kg, (INNER_DIM,), jnp.float32)
    beta = 0.1 * jax.random.normal(kb, (INNER_DIM,), jnp.float32)

    out = norm_linear_attention(x, w_qkv, gamma, beta, w_out, b_out)
    out = jax.block_until_ready(out)

    ref = reference(x, w_qkv, gamma, beta, w_out, b_out)
    # bf16 MXU operands (f32 accumulate) vs fp32 HIGHEST reference.
    np.testing.assert_allclose(np.asarray(out), np.asarray(ref),
                               rtol=2e-2, atol=2e-2)
    print("KERNEL_OK")
</pallas_src>

<mosaic_0001>
module attributes {stable_mosaic.version = 11 : i64} {
  func.func @norm_linear_attn_kernel(%arg0: i32, %arg1: memref<16x32xf32, #tpu.memory_space<vmem>>, %arg2: memref<32x96xbf16, #tpu.memory_space<vmem>>, %arg3: memref<32x32xbf16, #tpu.memory_space<vmem>>, %arg4: memref<1x32xf32, #tpu.memory_space<vmem>>, %arg5: memref<16x32xf32, #tpu.memory_space<vmem>>) attributes {dimension_semantics = [#tpu.dimension_semantics<parallel>], iteration_bounds = array<i64: 2>, scalar_prefetch = 0 : i64, scratch_operands = 0 : i64, tpu.core_type = #tpu.core_type<tc>, window_params = [{transform_indices = @transform_0, window_bounds = array<i64: 16, 32>}, {pipeline_mode = #tpu.pipeline_mode<synchronous>, transform_indices = @transform_1, window_bounds = array<i64: 32, 96>}, {pipeline_mode = #tpu.pipeline_mode<synchronous>, transform_indices = @transform_2, window_bounds = array<i64: 32, 32>}, {pipeline_mode = #tpu.pipeline_mode<synchronous>, transform_indices = @transform_3, window_bounds = array<i64: 1, 32>}, {transform_indices = @transform_4, window_bounds = array<i64: 16, 32>}]} {
    %c0 = arith.constant 0 : index
    %c0_0 = arith.constant 0 : index
    %0 = vector.load %arg1[%c0, %c0_0] : memref<16x32xf32, #tpu.memory_space<vmem>>, vector<16x32xf32>
    %1 = arith.truncf %0 : vector<16x32xf32> to vector<16x32xbf16>
    %c0_1 = arith.constant 0 : index
    %c0_2 = arith.constant 0 : index
    %2 = vector.load %arg2[%c0_1, %c0_2] : memref<32x96xbf16, #tpu.memory_space<vmem>>, vector<32x96xbf16>
    %cst = arith.constant dense<0.000000e+00> : vector<16x96xf32>
    %3 = tpu.matmul %1, %2, %cst {dimension_numbers = #tpu.dot_dimension_numbers<[1], [0], [0], [1], [0, 0, 1, 1], [], []>} : vector<16x32xbf16>, vector<32x96xbf16>, vector<16x96xf32> -> vector<16x96xf32>
    %4 = vector.extract_strided_slice %3 {offsets = [0, 0], sizes = [16, 32], strides = [1, 1]} : vector<16x96xf32> to vector<16x32xf32>
    %cst_3 = arith.constant 0.000000e+00 : f32
    %5 = vector.broadcast %cst_3 : f32 to vector<16x32xf32>
    %6 = arith.maximumf %4, %5 : vector<16x32xf32>
    %7 = vector.extract_strided_slice %3 {offsets = [0, 32], sizes = [16, 32], strides = [1, 1]} : vector<16x96xf32> to vector<16x32xf32>
    %cst_4 = arith.constant 0.000000e+00 : f32
    %8 = vector.broadcast %cst_4 : f32 to vector<16x32xf32>
    %9 = arith.maximumf %7, %8 : vector<16x32xf32>
    %10 = vector.extract_strided_slice %3 {offsets = [0, 64], sizes = [16, 32], strides = [1, 1]} : vector<16x96xf32> to vector<16x32xf32>
    %11 = arith.truncf %9 : vector<16x32xf32> to vector<16x32xbf16>
    %12 = arith.truncf %10 : vector<16x32xf32> to vector<16x32xbf16>
    %cst_5 = arith.constant dense<0.000000e+00> : vector<32x32xf32>
    %13 = tpu.matmul %11, %12, %cst_5 {dimension_numbers = #tpu.dot_dimension_numbers<[0], [0], [1], [1], [0, 1, 1, 1], [], []>} : vector<16x32xbf16>, vector<16x32xbf16>, vector<32x32xf32> -> vector<32x32xf32>
    %14 = tpu.iota {dimensions = array<i32: 0>} : vector<32x32xi32>
    %15 = tpu.iota {dimensions = array<i32: 1>} : vector<32x32xi32>
    %c3_i32 = arith.constant 3 : i32
    %16 = vector.broadcast %c3_i32 : i32 to vector<32x32xi32>
    %17 = arith.shrsi %14, %16 : vector<32x32xi32>
    %c3_i32_6 = arith.constant 3 : i32
    %18 = vector.broadcast %c3_i32_6 : i32 to vector<32x32xi32>
    %19 = arith.shrsi %15, %18 : vector<32x32xi32>
    %20 = arith.cmpi eq, %17, %19 : vector<32x32xi32>
    %cst_7 = arith.constant 0.000000e+00 : f32
    %21 = vector.broadcast %cst_7 : f32 to vector<32x32xf32>
    %22 = arith.select %20, %13, %21 : vector<32x32xi1>, vector<32x32xf32>
    %23 = arith.truncf %6 : vector<16x32xf32> to vector<16x32xbf16>
    %24 = arith.truncf %22 : vector<32x32xf32> to vector<32x32xbf16>
    %cst_8 = arith.constant dense<0.000000e+00> : vector<16x32xf32>
    %25 = tpu.matmul %23, %24, %cst_8 {dimension_numbers = #tpu.dot_dimension_numbers<[1], [0], [0], [1], [0, 0, 1, 1], [], []>} : vector<16x32xbf16>, vector<32x32xbf16>, vector<16x32xf32> -> vector<16x32xf32>
    %cst_9 = arith.constant dense<0.000000e+00> : vector<16xf32>
    %26 = vector.multi_reduction <add>, %25, %cst_9 [1] : vector<16x32xf32> to vector<16xf32>
    %27 = vector.shape_cast %26 : vector<16xf32> to vector<16x1xf32>
    %cst_10 = arith.constant 3.200000e+01 : f32
    %28 = vector.broadcast %cst_10 : f32 to vector<16x1xf32>
    %29 = arith.divf %27, %28 : vector<16x1xf32>
    %30 = vector.broadcast %29 : vector<16x1xf32> to vector<16x32xf32>
    %31 = arith.subf %25, %30 : vector<16x32xf32>
    %32 = arith.mulf %31, %31 : vector<16x32xf32>
    %cst_11 = arith.constant dense<0.000000e+00> : vector<16xf32>
    %33 = vector.multi_reduction <add>, %32, %cst_11 [1] : vector<16x32xf32> to vector<16xf32>
    %34 = vector.shape_cast %33 : vector<16xf32> to vector<16x1xf32>
    %cst_12 = arith.constant 3.200000e+01 : f32
    %35 = vector.broadcast %cst_12 : f32 to vector<16x1xf32>
    %36 = arith.divf %34, %35 : vector<16x1xf32>
    %cst_13 = arith.constant 9.99999974E-6 : f32
    %37 = vector.broadcast %cst_13 : f32 to vector<16x1xf32>
    %38 = arith.addf %36, %37 : vector<16x1xf32>
    %39 = math.rsqrt %38 : vector<16x1xf32>
    %40 = vector.broadcast %39 : vector<16x1xf32> to vector<16x32xf32>
    %41 = arith.mulf %31, %40 : vector<16x32xf32>
    %42 = arith.truncf %41 : vector<16x32xf32> to vector<16x32xbf16>
    %c0_14 = arith.constant 0 : index
    %c0_15 = arith.constant 0 : index
    %43 = vector.load %arg3[%c0_14, %c0_15] : memref<32x32xbf16, #tpu.memory_space<vmem>>, vector<32x32xbf16>
    %cst_16 = arith.constant dense<0.000000e+00> : vector<16x32xf32>
    %44 = tpu.matmul %42, %43, %cst_16 {dimension_numbers = #tpu.dot_dimension_numbers<[1], [0], [0], [1], [0, 0, 1, 1], [], []>} : vector<16x32xbf16>, vector<32x32xbf16>, vector<16x32xf32> -> vector<16x32xf32>
    %c0_17 = arith.constant 0 : index
    %c0_18 = arith.constant 0 : index
    %45 = vector.load %arg4[%c0_17, %c0_18] : memref<1x32xf32, #tpu.memory_space<vmem>>, vector<1x32xf32>
    %46 = vector.broadcast %45 : vector<1x32xf32> to vector<16x32xf32>
    %47 = arith.addf %44, %46 : vector<16x32xf32>
    %c0_19 = arith.constant 0 : index
    %c0_20 = arith.constant 0 : index
    %48 = vector.load %arg5[%c0_19, %c0_20] : memref<16x32xf32, #tpu.memory_space<vmem>>, vector<16x32xf32>
    tpu.vector_store %arg5[%c0_19, %c0_20], %47 {strides = array<i32>} : memref<16x32xf32, #tpu.memory_space<vmem>>, vector<16x32xf32>,
    return
  }
  func.func @transform_0(%arg0: i32) -> (i32, i32) {
    %c0_i32 = arith.constant 0 : i32
    %c0_i32_0 = arith.constant 0 : i32
    return %arg0, %c0_i32 : i32, i32
  }
  func.func @transform_1(%arg0: i32) -> (i32, i32) {
    %c0_i32 = arith.constant 0 : i32
    %c0_i32_0 = arith.constant 0 : i32
    %c0_i32_1 = arith.constant 0 : i32
    return %c0_i32, %c0_i32_0 : i32, i32
  }
  func.func @transform_2(%arg0: i32) -> (i32, i32) {
    %c0_i32 = arith.constant 0 : i32
    %c0_i32_0 = arith.constant 0 : i32
    %c0_i32_1 = arith.constant 0 : i32
    return %c0_i32, %c0_i32_0 : i32, i32
  }
  func.func @transform_3(%arg0: i32) -> (i32, i32) {
    %c0_i32 = arith.constant 0 : i32
    %c0_i32_0 = arith.constant 0 : i32
    %c0_i32_1 = arith.constant 0 : i32
    return %c0_i32, %c0_i32_0 : i32, i32
  }
  func.func @transform_4(%arg0: i32) -> (i32, i32) {
    %c0_i32 = arith.constant 0 : i32
    %c0_i32_0 = arith.constant 0 : i32
    return %arg0, %c0_i32 : i32, i32
  }
}

</mosaic_0001>

<bundles_post_ra>
// kernel: tpu_custom_call.1
= control target key start
LH: loop header
LB: loop body
LE: loop exit
PB: predicated region body
PF: predicated region fallthrough
CT: control target
= control target key end

     0   :  { %9 = vsyncpa [#allocation3], 0  ;;  %s1288_s0 = inlined_call_operand.hbm [shape: f32[32,32], index: 0, kind: input, shape index: {}]   ;;  %s1289_s1 = inlined_call_operand.hbm [shape: bf16[32,96], index: 1, kind: input, shape index: {}]   ;;  %s1290_s2 = inlined_call_operand.hbm [shape: bf16[32,32], index: 2, kind: input, shape index: {}]   ;;  %s1291_s3 = inlined_call_operand.vmem [shape: f32[1,32], index: 3, kind: input, shape index: {}]   ;;  %s1292_s4 = inlined_call_operand.hbm [shape: f32[32,32], index: 4, kind: output, shape index: {}]  }
   0x1   :  { %11 = vsyncpa [#allocation3 + $0x1], 0 }
   0x2   :  { %12 = vsyncpa [#allocation6], 0 }
   0x3   :  { %13 = vsyncpa [#allocation4], 0 }
   0x4   :  { %15 = vsyncpa [#allocation4 + $0x1], 0  ;;  %s1026_s15 = smov 0   ;;  %s1028_s16 = smov 0  }
   0x5   :  { %s1030_s17 = smov 0   ;;  %s1032_s18 = smov 0  }
   0x6 LB: > { %s1047_s19 = sadd.s32 4294967295, %s985_s18   ;;  %s665_s20 = sadd.s32 4294967294, %s985_s18   ;;  %s985_s18 = sphi %s1032_s18, %s1312_s18   ;;  %s981_s17 = sphi %s1030_s17, %s1311_s17   ;;  %s977_s16 = sphi %s1028_s16, %s1310_s16   ;;  %s973_s15 = sphi %s1026_s15, %s1309_s15  }
   0x7   : > { %p41_p0 = scmp.ne.s32.totalorder %s977_s16, %s973_s15  ;;  %p1293_p1 = scmp.eq.s32.totalorder %s1047_s19, 0 }
   0x8   : > { %p134_p3 = scmp.eq.s32.totalorder %s665_s20, 1  ;;  %p666_p5 = scmp.ge.s32.totalorder %s985_s18, 1 }
   0x9   : > { %p1056_p4 = por %p1293_p1, %p41_p0  ;;  %p141_p7 = scmp.lt.s32.totalorder %s985_s18, 3 }
   0xa   : > { %p1061_p6 = por %p134_p3, %p41_p0  ;;  %s987_s24 = smov [#allocation5]  }
   0xb   : > { %s1296_s21 = scalar_select %p1056_p4, 1, 0 }
   0xc   : > { %s1297_s22 = scalar_select %p1061_p6, 1, 0 }
   0xd   : > { %p1066_p8 = pnand %p666_p5, %p141_p7  ;;  %s153_s25 = sshll.u32 %s987_s24, 4  ;;  %s1070_s25 = int_to_ptr.vmem [resolvable:$true] %s153_s25 }
   0xe   : > { %s988_s27 = smov [#allocation7]   ;;  %s829_s5 = scalar_lea.hbm %s1289_s1, 256 }
   0xf   : > { %p755_p9 = pneg %p1066_p8  ;;  %s166_s28 = sshll.u32 %s988_s27, 4  ;;  %s1081_s28 = int_to_ptr.vmem [resolvable:$true] %s166_s28 }
  0x10   : > { %p830_p12 = scmp.ne.s32.totalorder %s1289_s1, %s829_s5  ;;  %p836_p5 = scmp.lt.u32.totalorder %s829_s5, %s1289_s1 }
  0x11   : > { %p1077_p11 = pnand %p755_p9, %p1293_p1 }
  0x13   : > { %p831_p13 = pneg %p1077_p11 }
  0x15   : > { %p832_p0 = pnand %p831_p13, %p830_p12 }
  0x17   : > { %p833_p3 = pneg %p832_p0 }
  0x19   : > { %p838_p7 = pnand %p836_p5, %p833_p3 }
  0x1b   : > { %841 = shalt.err (!%p838_p7)
}
  0x1c   : > { %s842_s10 = scalar_lea.vmem %s1070_s25, 256  ;;  %p850_p2 = scmp.lt.s32.totalorder %s1070_s25, %s1070_s25 }
  0x1d   : > { %p843_p9 = scmp.ne.s32.totalorder %s1070_s25, %s842_s10  ;;  %p851_p12 = scmp.lt.s32.totalorder %s842_s10, %s842_s10 }
  0x1f   : > { %p845_p10 = pnand %p843_p9, %p831_p13  ;;  %p852_p0 = por %p851_p12, %p850_p2 }
  0x21   : > { %p846_p1 = pneg %p845_p10 }
  0x23   : > { %p853_p6 = pnand %p852_p0, %p846_p1 }
  0x25   : > { %856 = shalt.err (!%p853_p6)
}
  0x26   : > { %s989_s11 = smov 64   ;;  %s990_s12 = smov 4  }
  0x27   : > { %758 = dma.hbm_to_vmem [thread:$0]  (!%p1077_p11), %s1289_s1, 256, %s1070_s25, [#allocation6], %s989_s11, %s989_s11, %s990_s12  }
  0x28   : > { %s857_s27 = scalar_lea.hbm %s1290_s2, 256 }
  0x29   : > { %p858_p2 = scmp.ne.s32.totalorder %s1290_s2, %s857_s27  ;;  %p864_p10 = scmp.lt.u32.totalorder %s857_s27, %s1290_s2 }
  0x2b   : > { %p860_p1 = pnand %p858_p2, %p831_p13 }
  0x2d   : > { %p861_p6 = pneg %p860_p1 }
  0x2f   : > { %p866_p3 = pnand %p864_p10, %p861_p6 }
  0x31   : > { %869 = shalt.err (!%p866_p3)
}
  0x32   : > { %s870_s25 = scalar_lea.vmem %s1081_s28, 256  ;;  %p878_p12 = scmp.lt.s32.totalorder %s1081_s28, %s1081_s28 }
  0x33   : > { %p871_p5 = scmp.ne.s32.totalorder %s1081_s28, %s870_s25  ;;  %p879_p0 = scmp.lt.s32.totalorder %s870_s25, %s870_s25 }
  0x35   : > { %p873_p7 = pnand %p871_p5, %p831_p13  ;;  %p880_p2 = por %p879_p0, %p878_p12 }
  0x37   : > { %p874_p9 = pneg %p873_p7 }
  0x39   : > { %p881_p1 = pnand %p880_p2, %p874_p9 }
  0x3b   : > { %884 = shalt.err (!%p881_p1)
}
  0x3c   : > { %761 = dma.hbm_to_vmem [thread:$0]  (!%p1077_p11), %s1290_s2, 256, %s1081_s28, [#allocation6], %s989_s11, %s989_s11, %s990_s12  }
  0x3d   : > { %s1136_s9 = sadd.s32 1, %s985_s18   ;;  %s28_s26 = sadd.s32 1, %s981_s17 }
  0x3e   : > { %s25_s10 = ssub.s32 %s985_s18, %s1136_s9  ;;  %p35_p13 = scmp.ne.s32.totalorder %s981_s17, %s977_s16 }
  0x3f   : > { %p26_p6 = scmp.eq.s32.totalorder %s25_s10, 0  ;;  %p36_p10 = scmp.eq.s32.totalorder %s985_s18, 0 }
  0x40   : > { %p1300_p3 = scmp.eq.s32.totalorder %s1047_s19, 1  ;;  %p772_p7 = scmp.lt.s32.totalorder %s985_s18, 2 }
  0x41   : > { %s1152_s14 = scalar_select %p26_p6, %s981_s17, %s28_s26  }
  0x42   : > { %p1146_p5 = por %p1300_p3, %p35_p13  ;;  %p37_p9 = por %p36_p10, %p35_p13 }
  0x43   : > { %s183_s20 = sand.u32 1, %s981_s17   ;;  %s699_s28 = sshll.u32 %s985_s18, 8 }
  0x44   : > { %s1301_s13 = scalar_select %p1146_p5, 1, 0 }
  0x45   : > { %s670_s24 = sshll.u32 %s183_s20, 4  ;;  %s1159_s27 = scalar_lea.hbm %s1288_s0, %s699_s28 }
  0x46   : > { %s187_s29 = scalar_lea.vmem [#allocation2], %s670_s24  ;;  %p1163_p11 = pnand %p772_p7, %p37_p9 }
  0x47   : > { %s194_s30 = sshll.u32 %s187_s29, 4  ;;  %s1167_s6 = scalar_lea.sflag [#allocation3], %s183_s20  ;;  %s1161_s30 = int_to_ptr.vmem [resolvable:$true] %s194_s30 }
  0x48   : > { %s885_s25 = scalar_lea.hbm %s1159_s27, 256  ;;  %p887_p0 = pneg %p1163_p11 }
  0x49   : > { %p886_p12 = scmp.ne.s32.totalorder %s1159_s27, %s885_s25  ;;  %s890_s26 = scalar_lea.hbm %s1288_s0, 512 }
  0x4a   : > { %p891_p13 = scmp.lt.u32.totalorder %s1159_s27, %s1288_s0  ;;  %p892_p6 = scmp.lt.u32.totalorder %s890_s26, %s885_s25 }
  0x4b   : > { %p888_p2 = pnand %p887_p0, %p886_p12  ;;  %p894_p3 = scmp.lt.u32.totalorder %s885_s25, %s1159_s27 }
  0x4c   : > { %p893_p10 = por %p892_p6, %p891_p13 }
  0x4d   : > { %p889_p1 = pneg %p888_p2 }
  0x4e   : > { %p895_p7 = por %p894_p3, %p893_p10 }
  0x50   : > { %p896_p9 = pnand %p895_p7, %p889_p1 }
  0x52   : > { %899 = shalt.err (!%p896_p9)
}
  0x53   : > { %s900_s20 = scalar_lea.vmem %s1161_s30, 256  ;;  %s991_s28 = smov [#allocation2]  }
  0x54   : > { %p901_p12 = scmp.ne.s32.totalorder %s1161_s30, %s900_s20  ;;  %s905_s11 = sshll.u32 %s991_s28, 4  ;;  %s906_s11 = int_to_ptr.vmem [resolvable:$false] %s905_s11 }
  0x55   : > { %s907_s12 = scalar_lea.vmem %s906_s11, 512  ;;  %p908_p4 = scmp.lt.s32.totalorder %s1161_s30, %s906_s11 }
  0x56   : > { %p903_p2 = pnand %p901_p12, %p887_p0  ;;  %p909_p13 = scmp.lt.s32.totalorder %s907_s12, %s900_s20 }
  0x58   : > { %p904_p5 = pneg %p903_p2  ;;  %p910_p6 = por %p909_p13, %p908_p4 }
  0x5a   : > { %p911_p10 = pnand %p910_p6, %p904_p5 }
  0x5c   : > { %914 = shalt.err (!%p911_p10)
}
  0x5d   : > { %s992_s29 = smov 128   ;;  %s993_s25 = smov 8  }
  0x5e   : > { %765 = dma.hbm_to_vmem [thread:$0]  (!%p1163_p11), %s1159_s27, 256, %s1161_s30, %s1167_s6, %s992_s29, %s992_s29, %s993_s25  }
  0x5f   : > { %206 = sbr.rel (%p1066_p8) target bundleno = 1537 (0x601), region = 36  ;;  %s1198_s7 = sand.u32 (!%p1066_p8), 1, %s977_s16  }
  0x60   : > { %s674_s8 = sshll.u32 (!%p1066_p8), %s1198_s7, 4  ;;  %s209_s26 = scalar_lea.sflag (!%p1066_p8), [#allocation3], %s1198_s7 }
  0x61   : > { %s212_s10 = scalar_lea.vmem (!%p1066_p8), [#allocation2], %s674_s8  ;;  %p1303_p4 = scmp.ne.s32.totalorder (!%p1066_p8), %s1296_s21, 0 }
  0x66   : > { %960 = dma.done.wait (%p1303_p4), %s209_s26, 256  }
  0x67   : > { %962 = vsyncadd (%p1303_p4), %s209_s26, 4294967040  ;;  %p1304_p5 = scmp.eq.s32.totalorder %s1047_s19, 0 }
  0x69   : > { %964 = dma.done.wait (%p1304_p5), [#allocation6], 512   ;;  %p1305_p8 = pmov %p1304_p5 }
  0x6a   : > { %v994_v0 = vmov 0.0   ;;  %vm995_vm0 = vmmov 0   ;;  %v821_v1 = vld [vmem:[#allocation5] sm:$0xff]   ;;  %v822_v2 = vld [vmem:[#allocation5 + $0x8] sm:$0xff]   ;;  %vm267_vm1 = vcmask 261120   ;;  %s996_s21 = smov 96   ;;  %v396_v18 = vlaneseq }
  0x6b   : > { %966 = vsyncadd (%p1305_p8), [#allocation6], 4294966784  ;;  %713 = vmatprep.subr.bf16.mxu0 %v994_v0  ;;  %717 = vmatprep.mubr.msk.bf16.mxu0 %vm995_vm0, %v994_v0  ;;  %v248_v3 = vld [vmem:[%s212_s10] sm:$0xff]  ;;  %v249_v4 = vld [vmem:[%s212_s10 + $0x8] sm:$0xff]  ;;  %s997_s23 = smov 64   ;;  %vm340_vm2 = vcmask 130048  }
  0x6c   : > { %714 = vmatpush3.bf16.msra.mxu0 %v821_v1  ;;  %v250_v5 = vpack.c.bf16 %v249_v4, %v248_v3  ;;  %v397_v19 = vshrl.u32 %v396_v18, 7  ;;  %v402_v21 = vand.u32 127, %v396_v18  ;;  %v823_v51 = vld [vmem:[#allocation7] sm:$0xff]   ;;  %v824_v52 = vld [vmem:[#allocation7 + $0x8] sm:$0xff]   ;;  %s244_s5 = scalar_lea.vmem [#allocation8], %s674_s8  ;;  %s700_s24 = sshll.u32 %s1047_s19, 8 }
  0x6d   : > { %715 = vmatprep.subr.bf16.mxu0 %v994_v0  ;;  %s573_s6 = sshll.u32 %s244_s5, 4  ;;  %s1242_s11 = scalar_lea.hbm %s1292_s4, %s700_s24  ;;  %s1237_s6 = int_to_ptr.vmem [resolvable:$true] %s573_s6 }
  0x6e   : > { %v398_v20 = vadd.s32 8, %v397_v19  ;;  %v403_v22 = vshra.s32 %v397_v19, 3  ;;  %v407_v24 = vshra.s32 %v402_v21, 3  ;;  %v399_v25 = vadd.s32 16, %v397_v19  ;;  %s560_s19 = scalar_lea.sflag [#allocation4], %s1198_s7  ;;  %s915_s12 = scalar_lea.vmem %s1237_s6, 256 }
  0x6f   : > { %v400_v26 = vadd.s32 24, %v397_v19  ;;  %p916_p11 = scmp.ne.s32.totalorder %s1237_s6, %s915_s12  ;;  %p1306_p0 = scmp.ne.s32.totalorder %s1301_s13, 0 }
  0x70   : > { %716 = vmatpush3.bf16.msra.mxu0 %v822_v2  ;;  %v404_v23 = vshra.s32 %v398_v20, 3  ;;  %vm408_vm3 = vcmp.eq.s32.totalorder %v403_v22, %v407_v24  ;;  %v405_v28 = vshra.s32 %v399_v25, 3  ;;  %s998_s29 = smov [#allocation8]  }
  0x71   : > { %735 = vmatprep.subr.bf16.mxu0 %v994_v0  ;;  %v406_v29 = vshra.s32 %v400_v26, 3  ;;  %p917_p1 = pnand %p916_p11, %p1306_p0  ;;  %s919_s25 = sshll.u32 %s998_s29, 4  ;;  %s920_s25 = int_to_ptr.vmem [resolvable:$false] %s919_s25 }
  0x72   : > { %vm409_vm4 = vcmp.eq.s32.totalorder %v404_v23, %v407_v24  ;;  %vm410_vm6 = vcmp.eq.s32.totalorder %v405_v28, %v407_v24  ;;  %s921_s8 = scalar_lea.vmem %s920_s25, 512  ;;  %p922_p7 = scmp.lt.s32.totalorder %s1237_s6, %s920_s25 }
  0x73   : > { %718 = vmatmul.mubr.msk.bf16.vlgmr.msra.gmra.mrb[0].mxu0 %vm267_vm1, %v250_v5  ;;  %vm683_vm5 = vmpackc.low %vm409_vm4, %vm408_vm3  ;;  %vm411_vm7 = vcmp.eq.s32.totalorder %v406_v29, %v407_v24  ;;  %p918_p3 = pneg %p917_p1  ;;  %p923_p9 = scmp.lt.s32.totalorder %s921_s8, %s915_s12 }
  0x74   : > { %739 = vmatprep.mubr.msk.bf16.mxu0 %vm995_vm0, %v994_v0  ;;  %vm686_vm8 = vmpackc.low %vm411_vm7, %vm410_vm6  ;;  %736 = vmatpush3.bf16.msra.mxu0 %v823_v51 }
  0x75   : > { %737 = vmatprep.subr.bf16.mxu0 %v994_v0  ;;  %p924_p12 = por %p923_p9, %p922_p7 }
  0x77   : > { %p925_p2 = pnand %p924_p12, %p918_p3 }
  0x78   : > { %738 = vmatpush3.bf16.msra.mxu0 %v824_v52 }
 0x146   : > { %v305_v6 = vpop.f32.mrb[0].mxu0 }
 0x147   : > { %v719_v7 = vpop.f32.mrb[1].mxu0  ;;  %v312_v9 = vmax.f32 %v305_v6, 0.0 }
 0x148   : > { %v308_v8 = vpop.f32.mrb[2].mxu0 }
 0x149   : > { %v313_v10 = vmax.f32 %v308_v8, 0.0  ;;  %v315_v11 = vpack.c.bf16 %v308_v8, %v305_v6  ;;  %v720_v12 = vpop.f32.mrb[3].mxu0 }
 0x14b   : > { %v314_v13 = vpack.c.bf16 %v313_v10, %v312_v9 }
 0x14d   : > { %317 = vrot.lane.b32.xlu0 %v314_v13, %s996_s21 }
 0x151   : > { %337 = vrot.lane.b32.xlu0 %v315_v11, %s997_s23 }
 0x1bf   : > { %v318_v14 = vpop.permute.xlu0 %317 }
 0x1c0   : > { %320 = vxpose.xlu1.c.b16.start.end [1/1] (short) (narrow) %v318_v14, 32 }
 0x1c3   : > { %v338_v15 = vpop.permute.xlu0 %337 }
 0x1c4   : > { %721 = vmatprep.subr.bf16.mxu1 %v338_v15 }
 0x1c5   : > { %722 = vmatpush3.bf16.msra.mxu1 %v338_v15 }
 0x1c6   : > { %727 = vmatprep.subr.bf16.mxu1 %v994_v0 }
 0x226   : > { %v328_v16 = vpop.trf.xlu1 }
 0x227   : > { %723 = vmatprep.mubr.msk.bf16.mxu1 %vm340_vm2, %v328_v16 }
 0x22a   : > { %v329_v17 = vpop.trf.xlu1 }
 0x22b   : > { %724 = vmatmul.mubr.msk.bf16.vlgmr.msra.gmra.mrb[0].mxu1 %vm340_vm2, %v329_v17 }
 0x22c   : > { %731 = vmatprep.mubr.msk.bf16.mxu1 %vm995_vm0, %v994_v0 }
 0x2fe   : > { %v725_v27 = vpop.f32.mrb[0].mxu1 }
 0x2ff   : > { %v381_v30 = vpop.f32.mrb[1].mxu1 }
 0x300   : > { %v726_v31 = vpop.f32.mrb[2].mxu1 }
 0x301   : > { %v687_v32 = vpack.c.bf16 %v726_v31, %v725_v27  ;;  %v384_v33 = vpop.f32.mrb[3].mxu1 }
 0x302   : > { %v684_v34 = vpack.c.bf16 %v384_v33, %v381_v30 }
 0x304   : > { %728 = vmatpush3.bf16.msk.msra.mxu1 %vm683_vm5, %v684_v34 }
 0x305   : > { %729 = vmatprep.subr.bf16.mxu1 %v994_v0  ;;  %v690_v0 = vld [vmem:[%s1291_s3] ss:$0 sm:$0xff] }
 0x308   : > { %730 = vmatpush3.bf16.msk.msra.mxu1 %vm686_vm8, %v687_v32 }
 0x30b   : > { %732 = vmatmul.mubr.msk.bf16.vlgmr.msra.gmra.mrb[4].mxu1 %vm267_vm1, %v314_v13 }
 0x3de   : > { %v455_v35 = vpop.f32.mrb[4].mxu1 }
 0x3df   : > { %v733_v36 = vpop.f32.mrb[5].mxu1  ;;  %v462_v37 = vsel %vm267_vm1, %v455_v35, 0.0 }
 0x3e0   : > { %463 = vadd.xlane.f32.xlu1 %v462_v37  ;;  %v458_v38 = vpop.f32.mrb[6].mxu1 }
 0x3e1   : > { %v734_v39 = vpop.f32.mrb[7].mxu1  ;;  %v465_v40 = vsel %vm267_vm1, %v458_v38, 0.0 }
 0x3e2   : > { %466 = vadd.xlane.f32.xlu0 %v465_v40 }
 0x46d   : > { %v464_v41 = vpop.xlane.xlu1 %463 }
 0x46e   : > { %v469_v42 = vmul.f32 0.03125, %v464_v41 }
 0x46f   : > { %v467_v43 = vpop.xlane.xlu0 %466 }
 0x470   : > { %v471_v44 = vsub.f32 %v455_v35, %v469_v42  ;;  %v470_v45 = vmul.f32 0.03125, %v467_v43 }
 0x472   : > { %v472_v46 = vsub.f32 %v458_v38, %v470_v45  ;;  %v473_v47 = vmul.f32 %v471_v44, %v471_v44 }
 0x474   : > { %v475_v48 = vsel %vm267_vm1, %v473_v47, 0.0  ;;  %v474_v49 = vmul.f32 %v472_v46, %v472_v46 }
 0x475   : > { %476 = vadd.xlane.f32.xlu1 %v475_v48 }
 0x476   : > { %v478_v50 = vsel %vm267_vm1, %v474_v49, 0.0 }
 0x479   : > { %479 = vadd.xlane.f32.xlu1 %v478_v50 }
 0x502   : > { %v477_v53 = vpop.xlane.xlu1 %476 }
 0x503   : > { %v481_v54 = vmul.f32 0.03125, %v477_v53 }
 0x505   : > { %v483_v55 = vadd.f32 1e-05, %v481_v54 }
 0x506   : > { %v480_v56 = vpop.xlane.xlu1 %479 }
 0x507   : > { %v482_v57 = vmul.f32 0.03125, %v480_v56  ;;  %825 = vrsqrt.f32 %v483_v55 }
 0x509   : > { %v484_v58 = vadd.f32 1e-05, %v482_v57 }
 0x50b   : > { %827 = vrsqrt.f32 %v484_v58 }
 0x511   : > { %v826_v59 = vpop.eup %825 }
 0x512   : > { %v487_v61 = vmul.f32 %v826_v59, %v471_v44 }
 0x515   : > { %v828_v60 = vpop.eup %827 }
 0x516   : > { %v488_v62 = vmul.f32 %v828_v60, %v472_v46 }
 0x518   : > { %v489_v63 = vpack.c.bf16 %v488_v62, %v487_v61 }
 0x51a   : > { %740 = vmatmul.mubr.msk.bf16.vlgmr.msra.gmra.mrb[4].mxu0 %vm267_vm1, %v489_v63 }
 0x5ed   : > { %v550_v1 = vpop.f32.mrb[4].mxu0 }
 0x5ee   : > { %v551_v2 = vadd.f32 %v690_v0, %v550_v1  ;;  %v741_v3 = vpop.f32.mrb[5].mxu0 }
 0x5ef   : > { %v553_v4 = vpop.f32.mrb[6].mxu0 }
 0x5f0   : > { %557 = vst.msk [vmem:[%s244_s5] sm:$0xff] %vm267_vm1, %v551_v2  ;;  %v554_v5 = vadd.f32 %v690_v0, %v553_v4  ;;  %v742_v6 = vpop.f32.mrb[7].mxu0 }
 0x5f2   : > { %558 = vst.msk [vmem:[%s244_s5 + $0x8] sm:$0xff] %vm267_vm1, %v554_v5 }
 0x5f3   : > { %928 = shalt.err (!%p925_p2)
}
 0x5f4   : > { %s929_s26 = scalar_lea.hbm %s1242_s11, 256  ;;  %s933_s23 = scalar_lea.hbm %s1292_s4, 512 }
 0x5f5   : > { %p930_p13 = scmp.ne.s32.totalorder %s1242_s11, %s929_s26  ;;  %p934_p4 = scmp.lt.u32.totalorder %s1242_s11, %s1292_s4 }
 0x5f6   : > { %p935_p5 = scmp.lt.u32.totalorder %s933_s23, %s929_s26  ;;  %p937_p11 = scmp.lt.u32.totalorder %s929_s26, %s1242_s11 }
 0x5f7   : > { %p931_p6 = pnand %p930_p13, %p1306_p0 }
 0x5f8   : > { %p936_p8 = por %p935_p5, %p934_p4 }
 0x5f9   : > { %p932_p10 = pneg %p931_p6 }
 0x5fa   : > { %p938_p1 = por %p937_p11, %p936_p8 }
 0x5fc   : > { %p939_p3 = pnand %p938_p1, %p932_p10 }
 0x5fe   : > { %942 = shalt.err (!%p939_p3)
}
 0x5ff   : > { %s999_s5 = smov 128   ;;  %s1000_s24 = smov 8  }
 0x600   : > { %753 = dma.vmem_to_hbm [thread:$0]  (%p1306_p0), %s1237_s6, 256, %s1242_s11, %s560_s19, %s999_s5, %s999_s5, %s1000_s24  }
 0x601 PF: > { %s588_s20 = sand.u32 1, %s973_s15   ;;  %p1307_p7 = scmp.ne.s32.totalorder %s1297_s22, 0 }
 0x602   : > { %p1308_p9 = scmp.ge.s32.totalorder %s985_s18, 2  ;;  %s589_s28 = scalar_lea.sflag [#allocation4], %s588_s20 }
 0x604   : > { %p767_p12 = pnand %p1308_p9, %p1307_p7 }
 0x606   : > { %968 = dma.done.wait (!%p767_p12), %s589_s28, 256  }
 0x607   : > { %970 = vsyncadd (!%p767_p12), %s589_s28, 4294967040  ;;  %p18_p2 = scmp.ge.s32.totalorder %s1136_s9, 4   ;;  %s1309_s15 = smov %s977_s16 }
 0x608   : > { %s1310_s16 = smov %s981_s17  ;;  %s1311_s17 = smov %s1152_s14 }
 0x609   : > { %s1312_s18 = smov %s1136_s9  ;;  %20 = sbr.rel (!%p18_p2) target bundleno = 6 (0x6), region = 89 }
 0x610   :  { %594 = vsyncpa [#allocation3], 1 }
 0x611   :  { %596 = vsyncpa [#allocation3 + $0x1], 1 }
 0x612   :  { %597 = vsyncpa [#allocation6], 1 }
 0x613   :  { %598 = vsyncpa [#allocation4], 1 }
 0x614   :  { %600 = vsyncpa [#allocation4 + $0x1], 1 }

</bundles_post_ra>
